<compile_context>
chip_gen: v7x
topology: tpu7x:2x2x1
jax: 0.10.0
libtpu: 0.0.40
codegen_flags: <defaults>
</compile_context>

<pallas_src>
import jax
import jax.numpy as jnp
from jax.experimental import pallas as pl
from jax.experimental.pallas import tpu as pltpu

IN_FEATURES = 512
OUT_FEATURES = 512
RANK = 4


def _lora_kernel(x_ref, a1_ref, b1_ref, bias1_ref, a2_ref, b2_ref, bias2_ref,
                 o_ref):
    """One M-tile of:  relu(x@A1@B1 + b1) @ A2 @ B2 + b2."""
    x = x_ref[...]                                               # (TM, 512)

    # LoRA layer 1: (TM,512)@(512,4)@(4,512) + (1,512)
    h = jnp.dot(x, a1_ref[...], preferred_element_type=jnp.float32)
    h = jnp.dot(h, b1_ref[...], preferred_element_type=jnp.float32)
    h = h + bias1_ref[...]

    # ReLU
    h = jnp.maximum(h, 0.0)

    # LoRA layer 2
    y = jnp.dot(h, a2_ref[...], preferred_element_type=jnp.float32)
    y = jnp.dot(y, b2_ref[...], preferred_element_type=jnp.float32)
    y = y + bias2_ref[...]

    o_ref[...] = y.astype(o_ref.dtype)


def _round_up(n, m):
    return ((n + m - 1) // m) * m


def lora_forward(x, a1, b1, bias1, a2, b2, bias2, *, tm=2048):
    """x: [M, 512] -> [M, 512]  (LoRA -> ReLU -> LoRA).

    Large M-tiles keep the kernel near the HBM roofline.  Ragged M is handled
    by Pallas' masked edge block — no wrapper-side padding or slicing copies.
    """
    M, F = x.shape
    assert F == IN_FEATURES

    if M <= tm:
        # Single tile equal to the full M extent (always a legal block shape).
        tm_eff = M
    else:
        # Tile must satisfy the (8, 128) divisibility rule on its sublane dim.
        tm_eff = _round_up(tm, 8)

    grid = (pl.cdiv(M, tm_eff),)

    # Scoped VMEM budget: double-buffered x + out tiles (input dtype) plus
    # f32 intermediates (h, y, acc copies) plus slack for weights/biases.
    # Capped below v7x's 64 MiB physical per-core VMEM.
    tile_bytes_in = tm_eff * IN_FEATURES * jnp.dtype(x.dtype).itemsize
    tile_bytes_f32 = tm_eff * OUT_FEATURES * 4
    vmem_limit = 4 * tile_bytes_in + 4 * tile_bytes_f32 + (4 << 20)
    vmem_limit = max(vmem_limit, 16 << 20)
    vmem_limit = min(vmem_limit, 56 << 20)

    # Weights/biases are tiny: every grid step sees the full tensor (constant
    # block index -> not re-fetched across steps).
    full = lambda shape: pl.BlockSpec(shape, lambda i: (0, 0))

    out = pl.pallas_call(
        _lora_kernel,
        out_shape=jax.ShapeDtypeStruct((M, OUT_FEATURES), x.dtype),
        grid_spec=pltpu.PrefetchScalarGridSpec(
            num_scalar_prefetch=0,
            grid=grid,
            in_specs=[
                pl.BlockSpec((tm_eff, IN_FEATURES), lambda i: (i, 0)),  # x tile
                full((IN_FEATURES, RANK)),                              # A1
                full((RANK, OUT_FEATURES)),                             # B1
                full((1, OUT_FEATURES)),                                # bias1
                full((OUT_FEATURES, RANK)),                             # A2
                full((RANK, OUT_FEATURES)),                             # B2
                full((1, OUT_FEATURES)),                                # bias2
            ],
            out_specs=pl.BlockSpec((tm_eff, OUT_FEATURES), lambda i: (i, 0)),
        ),
        compiler_params=pltpu.CompilerParams(
            dimension_semantics=("parallel",),
            vmem_limit_bytes=int(vmem_limit),
        ),
    )(x, a1, b1, bias1, a2, b2, bias2)

    return out


def lora_forward_batched(x_bsd, params, *, tm=2048):
    """x_bsd: [batch, seq, 512]  ->  [batch, seq, 512]."""
    B, S, F = x_bsd.shape
    x2d = x_bsd.reshape(B * S, F)
    y2d = lora_forward(x2d, *params, tm=tm)
    return y2d.reshape(B, S, F)


def _reference(x_bsd, params):
    a1, b1, bias1, a2, b2, bias2 = params
    h = x_bsd @ a1 @ b1 + bias1[0]
    h = jnp.maximum(h, 0.0)
    y = h @ a2 @ b2 + bias2[0]
    return y


if __name__ == "__main__":
    key = jax.random.PRNGKey(0)
    k_x, k_a1, k_b1, k_a2, k_b2 = jax.random.split(key, 5)

    # Deterministic parameter init mirroring nn.Parameter(torch.randn(...)) /
    # torch.zeros(...).
    a1 = jax.random.normal(k_a1, (IN_FEATURES, RANK), dtype=jnp.float32)
    b1 = jax.random.normal(k_b1, (RANK, OUT_FEATURES), dtype=jnp.float32)
    bias1 = jnp.zeros((1, OUT_FEATURES), dtype=jnp.float32)
    a2 = jax.random.normal(k_a2, (OUT_FEATURES, RANK), dtype=jnp.float32)
    b2 = jax.random.normal(k_b2, (RANK, OUT_FEATURES), dtype=jnp.float32)
    bias2 = jnp.zeros((1, OUT_FEATURES), dtype=jnp.float32)
    params = (a1, b1, bias1, a2, b2, bias2)

    # Small shape consistent with the module: batch=2, seq=8, features=512.
    batch, seq = 2, 8
    x = jax.random.normal(k_x, (batch, seq, IN_FEATURES), dtype=jnp.float32)

    y = jax.block_until_ready(lora_forward_batched(x, params))
    y_ref = _reference(x, params)
    assert y.shape == (batch, seq, OUT_FEATURES)
    assert jnp.allclose(y, y_ref, atol=1e-3, rtol=1e-3), "mismatch vs reference"

    # Second check exercising the large-tile + ragged-M path
    # (M=3000, tm=2048 -> grid=2 with a masked edge block, no padding copies).
    k_x2 = jax.random.fold_in(k_x, 1)
    x_big = jax.random.normal(k_x2, (2, 1500, IN_FEATURES), dtype=jnp.float32)
    y_big = jax.block_until_ready(lora_forward_batched(x_big, params))
    y_big_ref = _reference(x_big, params)
    assert y_big.shape == x_big.shape
    assert jnp.allclose(y_big, y_big_ref, atol=1e-3, rtol=1e-3), \
        "mismatch vs reference (large/ragged M)"

    print("KERNEL_OK")
</pallas_src>

<mosaic_0001>
module attributes {stable_mosaic.version = 11 : i64} {
  func.func @_lora_kernel(%arg0: i32, %arg1: memref<16x512xf32, #tpu.memory_space<vmem>>, %arg2: memref<512x4xf32, #tpu.memory_space<vmem>>, %arg3: memref<4x512xf32, #tpu.memory_space<vmem>>, %arg4: memref<1x512xf32, #tpu.memory_space<vmem>>, %arg5: memref<512x4xf32, #tpu.memory_space<vmem>>, %arg6: memref<4x512xf32, #tpu.memory_space<vmem>>, %arg7: memref<1x512xf32, #tpu.memory_space<vmem>>, %arg8: memref<16x512xf32, #tpu.memory_space<vmem>>) attributes {dimension_semantics = [#tpu.dimension_semantics<parallel>], iteration_bounds = array<i64: 1>, scalar_prefetch = 0 : i64, scratch_operands = 0 : i64, tpu.core_type = #tpu.core_type<tc>, window_params = [{transform_indices = @transform_0, window_bounds = array<i64: 16, 512>}, {pipeline_mode = #tpu.pipeline_mode<synchronous>, transform_indices = @transform_1, window_bounds = array<i64: 512, 4>}, {pipeline_mode = #tpu.pipeline_mode<synchronous>, transform_indices = @transform_2, window_bounds = array<i64: 4, 512>}, {pipeline_mode = #tpu.pipeline_mode<synchronous>, transform_indices = @transform_3, window_bounds = array<i64: 1, 512>}, {pipeline_mode = #tpu.pipeline_mode<synchronous>, transform_indices = @transform_4, window_bounds = array<i64: 512, 4>}, {pipeline_mode = #tpu.pipeline_mode<synchronous>, transform_indices = @transform_5, window_bounds = array<i64: 4, 512>}, {pipeline_mode = #tpu.pipeline_mode<synchronous>, transform_indices = @transform_6, window_bounds = array<i64: 1, 512>}, {transform_indices = @transform_7, window_bounds = array<i64: 16, 512>}]} {
    %c0 = arith.constant 0 : index
    %c0_0 = arith.constant 0 : index
    %0 = vector.load %arg1[%c0, %c0_0] : memref<16x512xf32, #tpu.memory_space<vmem>>, vector<16x512xf32>
    %c0_1 = arith.constant 0 : index
    %c0_2 = arith.constant 0 : index
    %1 = vector.load %arg2[%c0_1, %c0_2] : memref<512x4xf32, #tpu.memory_space<vmem>>, vector<512x4xf32>
    %cst = arith.constant dense<0.000000e+00> : vector<16x4xf32>
    %2 = tpu.matmul %0, %1, %cst {dimension_numbers = #tpu.dot_dimension_numbers<[1], [0], [0], [1], [0, 0, 1, 1], [], []>} : vector<16x512xf32>, vector<512x4xf32>, vector<16x4xf32> -> vector<16x4xf32>
    %c0_3 = arith.constant 0 : index
    %c0_4 = arith.constant 0 : index
    %3 = vector.load %arg3[%c0_3, %c0_4] : memref<4x512xf32, #tpu.memory_space<vmem>>, vector<4x512xf32>
    %cst_5 = arith.constant dense<0.000000e+00> : vector<16x512xf32>
    %4 = tpu.matmul %2, %3, %cst_5 {dimension_numbers = #tpu.dot_dimension_numbers<[1], [0], [0], [1], [0, 0, 1, 1], [], []>} : vector<16x4xf32>, vector<4x512xf32>, vector<16x512xf32> -> vector<16x512xf32>
    %c0_6 = arith.constant 0 : index
    %c0_7 = arith.constant 0 : index
    %5 = vector.load %arg4[%c0_6, %c0_7] : memref<1x512xf32, #tpu.memory_space<vmem>>, vector<1x512xf32>
    %6 = vector.broadcast %5 : vector<1x512xf32> to vector<16x512xf32>
    %7 = arith.addf %4, %6 : vector<16x512xf32>
    %cst_8 = arith.constant 0.000000e+00 : f32
    %8 = vector.broadcast %cst_8 : f32 to vector<16x512xf32>
    %9 = arith.maximumf %7, %8 : vector<16x512xf32>
    %c0_9 = arith.constant 0 : index
    %c0_10 = arith.constant 0 : index
    %10 = vector.load %arg5[%c0_9, %c0_10] : memref<512x4xf32, #tpu.memory_space<vmem>>, vector<512x4xf32>
    %cst_11 = arith.constant dense<0.000000e+00> : vector<16x4xf32>
    %11 = tpu.matmul %9, %10, %cst_11 {dimension_numbers = #tpu.dot_dimension_numbers<[1], [0], [0], [1], [0, 0, 1, 1], [], []>} : vector<16x512xf32>, vector<512x4xf32>, vector<16x4xf32> -> vector<16x4xf32>
    %c0_12 = arith.constant 0 : index
    %c0_13 = arith.constant 0 : index
    %12 = vector.load %arg6[%c0_12, %c0_13] : memref<4x512xf32, #tpu.memory_space<vmem>>, vector<4x512xf32>
    %cst_14 = arith.constant dense<0.000000e+00> : vector<16x512xf32>
    %13 = tpu.matmul %11, %12, %cst_14 {dimension_numbers = #tpu.dot_dimension_numbers<[1], [0], [0], [1], [0, 0, 1, 1], [], []>} : vector<16x4xf32>, vector<4x512xf32>, vector<16x512xf32> -> vector<16x512xf32>
    %c0_15 = arith.constant 0 : index
    %c0_16 = arith.constant 0 : index
    %14 = vector.load %arg7[%c0_15, %c0_16] : memref<1x512xf32, #tpu.memory_space<vmem>>, vector<1x512xf32>
    %15 = vector.broadcast %14 : vector<1x512xf32> to vector<16x512xf32>
    %16 = arith.addf %13, %15 : vector<16x512xf32>
    %c0_17 = arith.constant 0 : index
    %c0_18 = arith.constant 0 : index
    %17 = vector.load %arg8[%c0_17, %c0_18] : memref<16x512xf32, #tpu.memory_space<vmem>>, vector<16x512xf32>
    tpu.vector_store %arg8[%c0_17, %c0_18], %16 {strides = array<i32>} : memref<16x512xf32, #tpu.memory_space<vmem>>, vector<16x512xf32>,
    return
  }
  func.func @transform_0(%arg0: i32) -> (i32, i32) {
    %c0_i32 = arith.constant 0 : i32
    %c0_i32_0 = arith.constant 0 : i32
    return %arg0, %c0_i32 : i32, i32
  }
  func.func @transform_1(%arg0: i32) -> (i32, i32) {
    %c0_i32 = arith.constant 0 : i32
    %c0_i32_0 = arith.constant 0 : i32
    %c0_i32_1 = arith.constant 0 : i32
    return %c0_i32, %c0_i32_0 : i32, i32
  }
  func.func @transform_2(%arg0: i32) -> (i32, i32) {
    %c0_i32 = arith.constant 0 : i32
    %c0_i32_0 = arith.constant 0 : i32
    %c0_i32_1 = arith.constant 0 : i32
    return %c0_i32, %c0_i32_0 : i32, i32
  }
  func.func @transform_3(%arg0: i32) -> (i32, i32) {
    %c0_i32 = arith.constant 0 : i32
    %c0_i32_0 = arith.constant 0 : i32
    %c0_i32_1 = arith.constant 0 : i32
    return %c0_i32, %c0_i32_0 : i32, i32
  }
  func.func @transform_4(%arg0: i32) -> (i32, i32) {
    %c0_i32 = arith.constant 0 : i32
    %c0_i32_0 = arith.constant 0 : i32
    %c0_i32_1 = arith.constant 0 : i32
    return %c0_i32, %c0_i32_0 : i32, i32
  }
  func.func @transform_5(%arg0: i32) -> (i32, i32) {
    %c0_i32 = arith.constant 0 : i32
    %c0_i32_0 = arith.constant 0 : i32
    %c0_i32_1 = arith.constant 0 : i32
    return %c0_i32, %c0_i32_0 : i32, i32
  }
  func.func @transform_6(%arg0: i32) -> (i32, i32) {
    %c0_i32 = arith.constant 0 : i32
    %c0_i32_0 = arith.constant 0 : i32
    %c0_i32_1 = arith.constant 0 : i32
    return %c0_i32, %c0_i32_0 : i32, i32
  }
  func.func @transform_7(%arg0: i32) -> (i32, i32) {
    %c0_i32 = arith.constant 0 : i32
    %c0_i32_0 = arith.constant 0 : i32
    return %arg0, %c0_i32 : i32, i32
  }
}

</mosaic_0001>

<bundles_post_ra>
// kernel: tpu_custom_call.1
= control target key start
LH: loop header
LB: loop body
LE: loop exit
PB: predicated region body
PF: predicated region fallthrough
CT: control target
= control target key end

     0   :  { %s1745_s0 = inlined_call_operand.vmem [shape: f32[16,512], index: 0, kind: input, shape index: {}]   ;;  %s1746_s1 = inlined_call_operand.vmem [shape: f32[512,4], index: 1, kind: input, shape index: {}]   ;;  %s1747_s2 = inlined_call_operand.vmem [shape: f32[4,512], index: 2, kind: input, shape index: {}]   ;;  %s1748_s3 = inlined_call_operand.vmem [shape: f32[1,512], index: 3, kind: input, shape index: {}]   ;;  %s1749_s4 = inlined_call_operand.vmem [shape: f32[512,4], index: 4, kind: input, shape index: {}]   ;;  %s1750_s5 = inlined_call_operand.vmem [shape: f32[4,512], index: 5, kind: input, shape index: {}]   ;;  %s1751_s6 = inlined_call_operand.vmem [shape: f32[1,512], index: 6, kind: input, shape index: {}]   ;;  %s1752_s7 = inlined_call_operand.hbm [shape: f32[16,512], index: 7, kind: output, shape index: {}]  }
   0x1   :  { %v51_v0 = vld [vmem:[%s1746_s1 + $0x80] sm:$0xff]  ;;  %v52_v1 = vld [vmem:[%s1746_s1 + $0x88] sm:$0xff]  ;;  %v53_v11 = vld [vmem:[%s1746_s1 + $0x90] sm:$0xff] }
   0x2   :  { %v83_v2 = vld [vmem:[%s1746_s1 + $0x180] sm:$0xff]  ;;  %v1057_v3 = vpack.c.bf16 %v52_v1, %v51_v0  ;;  %v84_v4 = vld [vmem:[%s1746_s1 + $0x188] sm:$0xff]  ;;  %v54_v13 = vld [vmem:[%s1746_s1 + $0x98] sm:$0xff] }
   0x3   :  { %v35_v5 = vld [vmem:[%s1746_s1] sm:$0xff]  ;;  %v36_v6 = vld [vmem:[%s1746_s1 + $0x8] sm:$0xff]  ;;  %v1089_v7 = vpack.c.bf16 %v84_v4, %v83_v2  ;;  %v85_v14 = vld [vmem:[%s1746_s1 + $0x190] sm:$0xff]  ;;  %v1061_v16 = vpack.c.bf16 %v54_v13, %v53_v11 }
   0x4   :  { %v1059_v8 = vpack.c.bf16 %v36_v6, %v35_v5  ;;  %v67_v9 = vld [vmem:[%s1746_s1 + $0x100] sm:$0xff]  ;;  %v68_v10 = vld [vmem:[%s1746_s1 + $0x108] sm:$0xff]  ;;  %1058 = vmatprep.subr.bf16.mxu0 %v1057_v3  ;;  %v86_v15 = vld [vmem:[%s1746_s1 + $0x198] sm:$0xff] }
   0x5   :  { %v1091_v12 = vpack.c.bf16 %v68_v10, %v67_v9  ;;  %1090 = vmatprep.subr.bf16.mxu1 %v1089_v7  ;;  %v1093_v17 = vpack.c.bf16 %v86_v15, %v85_v14  ;;  %v37_v18 = vld [vmem:[%s1746_s1 + $0x10] sm:$0xff]  ;;  %v38_v19 = vld [vmem:[%s1746_s1 + $0x18] sm:$0xff]  ;;  %v55_v23 = vld [vmem:[%s1746_s1 + $0xa0] sm:$0xff] }
   0x6   :  { %1060 = vmatpush3.bf16.msra.mxu0 %v1059_v8  ;;  %v69_v20 = vld [vmem:[%s1746_s1 + $0x110] sm:$0xff]  ;;  %v1063_v21 = vpack.c.bf16 %v38_v19, %v37_v18  ;;  %v70_v22 = vld [vmem:[%s1746_s1 + $0x118] sm:$0xff]  ;;  %v56_v24 = vld [vmem:[%s1746_s1 + $0xa8] sm:$0xff] }
   0x7   :  { %1092 = vmatpush3.bf16.msra.mxu1 %v1091_v12  ;;  %1062 = vmatprep.subr.bf16.mxu0 %v1061_v16  ;;  %v1095_v25 = vpack.c.bf16 %v70_v22, %v69_v20  ;;  %v1065_v26 = vpack.c.bf16 %v56_v24, %v55_v23  ;;  %v87_v27 = vld [vmem:[%s1746_s1 + $0x1a0] sm:$0xff]  ;;  %v88_v28 = vld [vmem:[%s1746_s1 + $0x1a8] sm:$0xff]  ;;  %v57_v35 = vld [vmem:[%s1746_s1 + $0xb0] sm:$0xff] }
   0x8   :  { %1094 = vmatprep.subr.bf16.mxu1 %v1093_v17  ;;  %v39_v29 = vld [vmem:[%s1746_s1 + $0x20] sm:$0xff]  ;;  %v1097_v30 = vpack.c.bf16 %v88_v28, %v87_v27  ;;  %v40_v31 = vld [vmem:[%s1746_s1 + $0x28] sm:$0xff]  ;;  %v58_v36 = vld [vmem:[%s1746_s1 + $0xb8] sm:$0xff] }
   0x9   :  { %v71_v32 = vld [vmem:[%s1746_s1 + $0x120] sm:$0xff]  ;;  %v72_v33 = vld [vmem:[%s1746_s1 + $0x128] sm:$0xff]  ;;  %v1067_v34 = vpack.c.bf16 %v40_v31, %v39_v29  ;;  %v89_v37 = vld [vmem:[%s1746_s1 + $0x1b0] sm:$0xff]  ;;  %v1069_v39 = vpack.c.bf16 %v58_v36, %v57_v35 }
   0xa   :  { %1064 = vmatpush3.bf16.msra.mxu0 %v1063_v21  ;;  %v1099_v38 = vpack.c.bf16 %v72_v33, %v71_v32  ;;  %v90_v40 = vld [vmem:[%s1746_s1 + $0x1b8] sm:$0xff]  ;;  %v41_v41 = vld [vmem:[%s1746_s1 + $0x30] sm:$0xff]  ;;  %v59_v46 = vld [vmem:[%s1746_s1 + $0xc0] sm:$0xff] }
   0xb   :  { %1096 = vmatpush3.bf16.msra.mxu1 %v1095_v25  ;;  %1066 = vmatprep.subr.bf16.mxu0 %v1065_v26  ;;  %v42_v42 = vld [vmem:[%s1746_s1 + $0x38] sm:$0xff]  ;;  %v1101_v43 = vpack.c.bf16 %v90_v40, %v89_v37  ;;  %v73_v44 = vld [vmem:[%s1746_s1 + $0x130] sm:$0xff]  ;;  %v60_v47 = vld [vmem:[%s1746_s1 + $0xc8] sm:$0xff] }
   0xc   :  { %1098 = vmatprep.subr.bf16.mxu1 %v1097_v30  ;;  %v74_v45 = vld [vmem:[%s1746_s1 + $0x138] sm:$0xff]  ;;  %v91_v48 = vld [vmem:[%s1746_s1 + $0x1c0] sm:$0xff]  ;;  %v92_v49 = vld [vmem:[%s1746_s1 + $0x1c8] sm:$0xff]  ;;  %v1071_v50 = vpack.c.bf16 %v42_v42, %v41_v41  ;;  %v1073_v52 = vpack.c.bf16 %v60_v47, %v59_v46 }
   0xd   :  { %v1103_v51 = vpack.c.bf16 %v74_v45, %v73_v44  ;;  %v43_v53 = vld [vmem:[%s1746_s1 + $0x40] sm:$0xff]  ;;  %v44_v54 = vld [vmem:[%s1746_s1 + $0x48] sm:$0xff]  ;;  %v1105_v56 = vpack.c.bf16 %v92_v49, %v91_v48  ;;  %v61_v58 = vld [vmem:[%s1746_s1 + $0xd0] sm:$0xff] }
   0xe   :  { %1068 = vmatpush3.bf16.msra.mxu0 %v1067_v34  ;;  %v75_v55 = vld [vmem:[%s1746_s1 + $0x140] sm:$0xff]  ;;  %v76_v57 = vld [vmem:[%s1746_s1 + $0x148] sm:$0xff]  ;;  %v62_v59 = vld [vmem:[%s1746_s1 + $0xd8] sm:$0xff]  ;;  %v1075_v62 = vpack.c.bf16 %v44_v54, %v43_v53 }
   0xf   :  { %1100 = vmatpush3.bf16.msra.mxu1 %v1099_v38  ;;  %1070 = vmatprep.subr.bf16.mxu0 %v1069_v39  ;;  %v93_v60 = vld [vmem:[%s1746_s1 + $0x1d0] sm:$0xff]  ;;  %v94_v61 = vld [vmem:[%s1746_s1 + $0x1d8] sm:$0xff]  ;;  %v1107_v63 = vpack.c.bf16 %v76_v57, %v75_v55  ;;  %v1077_v0 = vpack.c.bf16 %v62_v59, %v61_v58  ;;  %v63_v6 = vld [vmem:[%s1746_s1 + $0xe0] sm:$0xff] }
  0x10   :  { %1102 = vmatprep.subr.bf16.mxu1 %v1101_v43  ;;  %v45_v1 = vld [vmem:[%s1746_s1 + $0x50] sm:$0xff]  ;;  %v46_v2 = vld [vmem:[%s1746_s1 + $0x58] sm:$0xff]  ;;  %v1109_v4 = vpack.c.bf16 %v94_v61, %v93_v60  ;;  %v64_v7 = vld [vmem:[%s1746_s1 + $0xe8] sm:$0xff] }
  0x11   :  { %v77_v3 = vld [vmem:[%s1746_s1 + $0x150] sm:$0xff]  ;;  %v78_v5 = vld [vmem:[%s1746_s1 + $0x158] sm:$0xff]  ;;  %v95_v8 = vld [vmem:[%s1746_s1 + $0x1e0] sm:$0xff]  ;;  %v1079_v10 = vpack.c.bf16 %v46_v2, %v45_v1  ;;  %v1081_v14 = vpack.c.bf16 %v64_v7, %v63_v6 }
  0x12   :  { %1072 = vmatpush3.bf16.msra.mxu0 %v1071_v50  ;;  %v96_v9 = vld [vmem:[%s1746_s1 + $0x1e8] sm:$0xff]  ;;  %v47_v11 = vld [vmem:[%s1746_s1 + $0x60] sm:$0xff]  ;;  %v1111_v13 = vpack.c.bf16 %v78_v5, %v77_v3  ;;  %v30_v17 = vld [vmem:[%s1745_s0 + $0x18] sm:$0xff] }
  0x13   :  { %1104 = vmatpush3.bf16.msra.mxu1 %v1103_v51  ;;  %1074 = vmatprep.subr.bf16.mxu0 %v1073_v52  ;;  %v48_v12 = vld [vmem:[%s1746_s1 + $0x68] sm:$0xff]  ;;  %v79_v15 = vld [vmem:[%s1746_s1 + $0x160] sm:$0xff]  ;;  %v1113_v18 = vpack.c.bf16 %v96_v9, %v95_v8  ;;  %v65_v20 = vld [vmem:[%s1746_s1 + $0xf0] sm:$0xff] }
  0x14   :  { %1106 = vmatprep.subr.bf16.mxu1 %v1105_v56  ;;  %v28_v16 = vld [vmem:[%s1745_s0 + $0x8] sm:$0xff]  ;;  %v66_v21 = vld [vmem:[%s1746_s1 + $0xf8] sm:$0xff]  ;;  %v97_v22 = vld [vmem:[%s1746_s1 + $0x1f0] sm:$0xff]  ;;  %238 = vmatprep.mubr.f32.mxu1 %v30_v17  ;;  %v1083_v24 = vpack.c.bf16 %v48_v12, %v47_v11 }
  0x15   :  { %v80_v19 = vld [vmem:[%s1746_s1 + $0x168] sm:$0xff]  ;;  %163 = vmatprep.mubr.f32.mxu0 %v28_v16  ;;  %v98_v23 = vld [vmem:[%s1746_s1 + $0x1f8] sm:$0xff] }
  0x16   :  { %1076 = vmatpush3.bf16.msra.mxu0 %v1075_v62 }
  0x17   :  { %1108 = vmatpush3.bf16.msra.mxu1 %v1107_v63  ;;  %1078 = vmatprep.subr.bf16.mxu0 %v1077_v0 }
  0x18   :  { %1110 = vmatprep.subr.bf16.mxu1 %v1109_v4 }
  0x1a   :  { %1080 = vmatpush3.bf16.msra.mxu0 %v1079_v10 }
  0x1b   :  { %12 = vsyncpa [#allocation3], 0  ;;  %1112 = vmatpush3.bf16.msra.mxu1 %v1111_v13  ;;  %1082 = vmatprep.subr.bf16.mxu0 %v1081_v14  ;;  %v1115_v25 = vpack.c.bf16 %v80_v19, %v79_v15  ;;  %v1085_v26 = vpack.c.bf16 %v66_v21, %v65_v20  ;;  %v49_v27 = vld [vmem:[%s1746_s1 + $0x70] sm:$0xff]  ;;  %v50_v28 = vld [vmem:[%s1746_s1 + $0x78] sm:$0xff]  ;;  %v1117_v29 = vpack.c.bf16 %v98_v23, %v97_v22  ;;  %vm284_vm0 = vcmask 1043456  }
  0x1c   :  { %1114 = vmatprep.subr.bf16.mxu1 %v1113_v18  ;;  %v81_v30 = vld [vmem:[%s1746_s1 + $0x170] sm:$0xff]  ;;  %v82_v31 = vld [vmem:[%s1746_s1 + $0x178] sm:$0xff]  ;;  %v249_v32 = vld [vmem:[%s1747_s2] sm:$0xff]  ;;  %v1087_v34 = vpack.c.bf16 %v50_v28, %v49_v27  ;;  %v1217_v44 = vmov 0.0   ;;  %vm277_vm1 = vcmask 31744  }
  0x1d   :  { %v250_v33 = vld [vmem:[%s1747_s2 + $0x8] sm:$0xff]  ;;  %v1119_v35 = vpack.c.bf16 %v82_v31, %v81_v30  ;;  %v275_v36 = vcombine.high %v249_v32, %v249_v32  ;;  %v27_v38 = vld [vmem:[%s1745_s0] sm:$0xff]  ;;  %v29_v39 = vld [vmem:[%s1745_s0 + $0x10] sm:$0xff] }
  0x1e   :  { %1084 = vmatpush3.bf16.msra.mxu0 %v1083_v24  ;;  %v276_v37 = vcombine.high %v250_v33, %v250_v33  ;;  %v32_v40 = vld [vmem:[%s1745_s0 + $0x28] sm:$0xff]  ;;  %v34_v41 = vld [vmem:[%s1745_s0 + $0x38] sm:$0xff]  ;;  %v31_v42 = vld [vmem:[%s1745_s0 + $0x20] sm:$0xff] }
  0x1f   :  { %1116 = vmatpush3.bf16.msra.mxu1 %v1115_v25  ;;  %1086 = vmatprep.subr.bf16.mxu0 %v1085_v26  ;;  %v33_v43 = vld [vmem:[%s1745_s0 + $0x30] sm:$0xff]  ;;  %v471_v45 = vld [vmem:[%s1749_s4 + $0x80] sm:$0xff]  ;;  %v472_v46 = vld [vmem:[%s1749_s4 + $0x88] sm:$0xff] }
  0x20   :  { %1118 = vmatprep.subr.bf16.mxu1 %v1117_v29  ;;  %v503_v47 = vld [vmem:[%s1749_s4 + $0x180] sm:$0xff]  ;;  %v1121_v48 = vpack.c.bf16 %v472_v46, %v471_v45  ;;  %v504_v49 = vld [vmem:[%s1749_s4 + $0x188] sm:$0xff]  ;;  %v473_v60 = vld [vmem:[%s1749_s4 + $0x90] sm:$0xff] }
  0x21   :  { %v1153_v50 = vpack.c.bf16 %v504_v49, %v503_v47  ;;  %v455_v54 = vld [vmem:[%s1749_s4] sm:$0xff]  ;;  %v456_v55 = vld [vmem:[%s1749_s4 + $0x8] sm:$0xff]  ;;  %v474_v62 = vld [vmem:[%s1749_s4 + $0x98] sm:$0xff] }
  0x22   :  { %1088 = vmatpush3.bf16.msra.mxu0 %v1087_v34  ;;  %v487_v58 = vld [vmem:[%s1749_s4 + $0x100] sm:$0xff]  ;;  %v488_v59 = vld [vmem:[%s1749_s4 + $0x108] sm:$0xff]  ;;  %v505_v63 = vld [vmem:[%s1749_s4 + $0x190] sm:$0xff]  ;;  %v1123_v5 = vpack.c.bf16 %v456_v55, %v455_v54  ;;  %v1125_v11 = vpack.c.bf16 %v474_v62, %v473_v60 }
  0x23   :  { %1120 = vmatpush3.bf16.msra.mxu1 %v1119_v35  ;;  %889 = vmatprep.subr.msk.mxu0 %vm284_vm0, %v275_v36  ;;  %v506_v0 = vld [vmem:[%s1749_s4 + $0x198] sm:$0xff]  ;;  %v1155_v6 = vpack.c.bf16 %v488_v59, %v487_v58  ;;  %v457_v7 = vld [vmem:[%s1749_s4 + $0x10] sm:$0xff]  ;;  %v475_v15 = vld [vmem:[%s1749_s4 + $0xa0] sm:$0xff] }
  0x24   :  { %893 = vmatprep.subr.msk.mxu1 %vm284_vm0, %v276_v37  ;;  %v458_v8 = vld [vmem:[%s1749_s4 + $0x18] sm:$0xff]  ;;  %v1157_v12 = vpack.c.bf16 %v506_v0, %v505_v63  ;;  %v489_v13 = vld [vmem:[%s1749_s4 + $0x110] sm:$0xff]  ;;  %v476_v17 = vld [vmem:[%s1749_s4 + $0xa8] sm:$0xff] }
  0x25   :  { %164 = vmatmul.mubr.f32.vlgmr.msra.gmra.mrb[0].mxu0 %v27_v38  ;;  %v490_v14 = vld [vmem:[%s1749_s4 + $0x118] sm:$0xff]  ;;  %v507_v18 = vld [vmem:[%s1749_s4 + $0x1a0] sm:$0xff]  ;;  %v508_v19 = vld [vmem:[%s1749_s4 + $0x1a8] sm:$0xff]  ;;  %v1127_v21 = vpack.c.bf16 %v458_v8, %v457_v7  ;;  %v1129_v25 = vpack.c.bf16 %v476_v17, %v475_v15 }
  0x26   :  { %239 = vmatmul.mubr.f32.vlgmr.msra.gmra.mrb[0].mxu1 %v29_v39  ;;  %168 = vmatprep.mubr.f32.mxu0 %v32_v40  ;;  %v1159_v22 = vpack.c.bf16 %v490_v14, %v489_v13  ;;  %v459_v23 = vld [vmem:[%s1749_s4 + $0x20] sm:$0xff]  ;;  %v460_v24 = vld [vmem:[%s1749_s4 + $0x28] sm:$0xff]  ;;  %v1161_v26 = vpack.c.bf16 %v508_v19, %v507_v18  ;;  %v477_v29 = vld [vmem:[%s1749_s4 + $0xb0] sm:$0xff] }
  0x27   :  { %243 = vmatprep.mubr.f32.mxu1 %v34_v41  ;;  %890 = vmatpush1.msk.msra.mxu0 %vm284_vm0, %v249_v32  ;;  %v491_v27 = vld [vmem:[%s1749_s4 + $0x120] sm:$0xff]  ;;  %v492_v28 = vld [vmem:[%s1749_s4 + $0x128] sm:$0xff]  ;;  %v478_v30 = vld [vmem:[%s1749_s4 + $0xb8] sm:$0xff] }
  0x28   :  { %894 = vmatpush1.msk.msra.mxu1 %vm284_vm0, %v250_v33  ;;  %1122 = vmatprep.subr.bf16.mxu0 %v1121_v48  ;;  %v509_v31 = vld [vmem:[%s1749_s4 + $0x1b0] sm:$0xff]  ;;  %v510_v32 = vld [vmem:[%s1749_s4 + $0x1b8] sm:$0xff]  ;;  %v1131_v33 = vpack.c.bf16 %v460_v24, %v459_v23  ;;  %v1163_v34 = vpack.c.bf16 %v492_v28, %v491_v27  ;;  %v1133_v37 = vpack.c.bf16 %v478_v30, %v477_v29  ;;  %v479_v41 = vld [vmem:[%s1749_s4 + $0xc0] sm:$0xff] }
  0x29   :  { %169 = vmatmul.mubr.f32.gmra.mrb[2].mxu0 %v31_v42  ;;  %1154 = vmatprep.subr.bf16.mxu1 %v1153_v50  ;;  %v461_v35 = vld [vmem:[%s1749_s4 + $0x30] sm:$0xff]  ;;  %v462_v36 = vld [vmem:[%s1749_s4 + $0x38] sm:$0xff]  ;;  %v1165_v38 = vpack.c.bf16 %v510_v32, %v509_v31  ;;  %v480_v42 = vld [vmem:[%s1749_s4 + $0xc8] sm:$0xff]  ;;  %v253_v32 = vlaneseq }
  0x2a   :  { %244 = vmatmul.mubr.f32.gmra.mrb[2].mxu1 %v33_v43  ;;  %357 = vmatprep.mubr.f32.mxu0 %v1217_v44  ;;  %v493_v39 = vld [vmem:[%s1749_s4 + $0x130] sm:$0xff]  ;;  %v494_v40 = vld [vmem:[%s1749_s4 + $0x138] sm:$0xff]  ;;  %v511_v43 = vld [vmem:[%s1749_s4 + $0x1c0] sm:$0xff]  ;;  %v1135_v46 = vpack.c.bf16 %v462_v36, %v461_v35  ;;  %v1137_v50 = vpack.c.bf16 %v480_v42, %v479_v41 }
  0x2b   :  { %434 = vmatprep.mubr.f32.mxu1 %v1217_v44  ;;  %v512_v45 = vld [vmem:[%s1749_s4 + $0x1c8] sm:$0xff]  ;;  %v1167_v47 = vpack.c.bf16 %v494_v40, %v493_v39  ;;  %v463_v48 = vld [vmem:[%s1749_s4 + $0x40] sm:$0xff]  ;;  %v481_v54 = vld [vmem:[%s1749_s4 + $0xd0] sm:$0xff] }
  0x2c   :  { %v464_v49 = vld [vmem:[%s1749_s4 + $0x48] sm:$0xff]  ;;  %v482_v55 = vld [vmem:[%s1749_s4 + $0xd8] sm:$0xff]  ;;  %v465_v60 = vld [vmem:[%s1749_s4 + $0x50] sm:$0xff] }
  0x2d   :  { %v1139_v58 = vpack.c.bf16 %v464_v49, %v463_v48  ;;  %v1141_v62 = vpack.c.bf16 %v482_v55, %v481_v54  ;;  %v497_v0 = vld [vmem:[%s1749_s4 + $0x150] sm:$0xff]  ;;  %v500_v14 = vld [vmem:[%s1749_s4 + $0x168] sm:$0xff]  ;;  %v486_v17 = vld [vmem:[%s1749_s4 + $0xf8] sm:$0xff] }
  0x2e   :  { %v517_v18 = vld [vmem:[%s1749_s4 + $0x1f0] sm:$0xff]  ;;  %v669_v28 = vld [vmem:[%s1750_s5] sm:$0xff]  ;;  %v670_v29 = vld [vmem:[%s1750_s5 + $0x8] sm:$0xff] }
  0x2f   :  { %v695_v30 = vcombine.high %v669_v28, %v669_v28  ;;  %v696_v31 = vcombine.high %v670_v29, %v670_v29  ;;  %v251_v36 = vld [vmem:[%s1748_s3] sm:$0xf] }
  0xf8   :  { %v937_v51 = vpop.f32.mrb[0].mxu0 }
  0xf9   :  { %v975_v52 = vpop.f32.mrb[0].mxu1  ;;  %v938_v53 = vpop.f32.mrb[1].mxu0 }
  0xfa   :  { %v939_v56 = vadd.f32 %v938_v53, %v937_v51  ;;  %v976_v57 = vpop.f32.mrb[1].mxu1  ;;  %v1169_v51 = vpack.c.bf16 %v512_v45, %v511_v43  ;;  %v496_v53 = vld [vmem:[%s1749_s4 + $0x148] sm:$0xff] }
  0xfb   :  { %v977_v61 = vadd.f32 %v976_v57, %v975_v52  ;;  %v495_v52 = vld [vmem:[%s1749_s4 + $0x140] sm:$0xff]  ;;  %v514_v57 = vld [vmem:[%s1749_s4 + $0x1d8] sm:$0xff] }
  0xfc   :  { %v940_v1 = vpop.f32.mrb[2].mxu0  ;;  %v1171_v59 = vpack.c.bf16 %v496_v53, %v495_v52 }
  0xfd   :  { %v241_v2 = vadd.f32 %v977_v61, %v939_v56  ;;  %v978_v3 = vpop.f32.mrb[2].mxu1  ;;  %v941_v4 = vpop.f32.mrb[3].mxu0  ;;  %v513_v56 = vld [vmem:[%s1749_s4 + $0x1d0] sm:$0xff]  ;;  %v466_v61 = vld [vmem:[%s1749_s4 + $0x58] sm:$0xff] }
  0xfe   :  { %v942_v9 = vadd.f32 %v941_v4, %v940_v1  ;;  %v979_v10 = vpop.f32.mrb[3].mxu1  ;;  %v1173_v63 = vpack.c.bf16 %v514_v57, %v513_v56  ;;  %v498_v1 = vld [vmem:[%s1749_s4 + $0x158] sm:$0xff]  ;;  %v515_v4 = vld [vmem:[%s1749_s4 + $0x1e0] sm:$0xff] }
  0xff   :  { %v980_v16 = vadd.f32 %v979_v10, %v978_v3  ;;  %891 = vmatmul.mubr.msk.f32.vlgmr.msra.gmra.mrb[4].mxu0 %vm277_vm1, %v241_v2  ;;  %895 = vmatmul.mubr.msk.f32.vlgmr.msra.gmra.mrb[4].mxu1 %vm277_vm1, %v241_v2  ;;  %v483_v2 = vld [vmem:[%s1749_s4 + $0xe0] sm:$0xff]  ;;  %v484_v3 = vld [vmem:[%s1749_s4 + $0xe8] sm:$0xff]  ;;  %v1175_v7 = vpack.c.bf16 %v498_v1, %v497_v0 }
 0x100   :  { %363 = vmatprep.mubr.f32.mxu0 %v1217_v44  ;;  %440 = vmatprep.mubr.f32.mxu1 %v1217_v44  ;;  %v1145_v8 = vpack.c.bf16 %v484_v3, %v483_v2  ;;  %v467_v10 = vld [vmem:[%s1749_s4 + $0x60] sm:$0xff] }
 0x101   :  { %v246_v20 = vadd.f32 %v980_v16, %v942_v9  ;;  %1124 = vmatpush3.bf16.msra.mxu0 %v1123_v5  ;;  %1156 = vmatpush3.bf16.msra.mxu1 %v1155_v6  ;;  %v516_v5 = vld [vmem:[%s1749_s4 + $0x1e8] sm:$0xff]  ;;  %v1143_v6 = vpack.c.bf16 %v466_v61, %v465_v60  ;;  %v485_v16 = vld [vmem:[%s1749_s4 + $0xf0] sm:$0xff] }
 0x102   :  { %1126 = vmatprep.subr.bf16.mxu0 %v1125_v11  ;;  %1158 = vmatprep.subr.bf16.mxu1 %v1157_v12  ;;  %v1177_v9 = vpack.c.bf16 %v516_v5, %v515_v4  ;;  %v468_v11 = vld [vmem:[%s1749_s4 + $0x68] sm:$0xff]  ;;  %v499_v12 = vld [vmem:[%s1749_s4 + $0x160] sm:$0xff]  ;;  %v1149_v19 = vpack.c.bf16 %v486_v17, %v485_v16 }
 0x103   :  { %892 = vmatmul.mubr.msk.f32.gmra.mrb[6].mxu0 %vm277_vm1, %v246_v20  ;;  %896 = vmatmul.mubr.msk.f32.gmra.mrb[6].mxu1 %vm277_vm1, %v246_v20  ;;  %v1147_v13 = vpack.c.bf16 %v468_v11, %v467_v10  ;;  %v1179_v15 = vpack.c.bf16 %v500_v14, %v499_v12  ;;  %v518_v20 = vld [vmem:[%s1749_s4 + $0x1f8] sm:$0xff] }
 0x104   :  { %v1181_v23 = vpack.c.bf16 %v518_v20, %v517_v18  ;;  %v671_v18 = vld [vmem:[%s1751_s6] sm:$0xf]  ;;  %s1218_s6 = smov [#allocation2]  }
 0x105   :  { %1128 = vmatpush3.bf16.msra.mxu0 %v1127_v21  ;;  %1160 = vmatpush3.bf16.msra.mxu1 %v1159_v22  ;;  %v469_v21 = vld [vmem:[%s1749_s4 + $0x70] sm:$0xff]  ;;  %v470_v22 = vld [vmem:[%s1749_s4 + $0x78] sm:$0xff]  ;;  %s878_s12 = sshll.u32 %s1218_s6, 4  ;;  %s879_s12 = int_to_ptr.vmem [resolvable:$true] %s878_s12 }
 0x106   :  { %1130 = vmatprep.subr.bf16.mxu0 %v1129_v25  ;;  %1162 = vmatprep.subr.bf16.mxu1 %v1161_v26  ;;  %v1151_v24 = vpack.c.bf16 %v470_v22, %v469_v21  ;;  %v501_v25 = vld [vmem:[%s1749_s4 + $0x170] sm:$0xff]  ;;  %v502_v26 = vld [vmem:[%s1749_s4 + $0x178] sm:$0xff]  ;;  %s1193_s0 = scalar_lea.vmem %s879_s12, 1024  ;;  %p1198_p1 = scmp.lt.s32.totalorder %s879_s12, %s879_s12 }
 0x107   :  { %v1183_v27 = vpack.c.bf16 %v502_v26, %v501_v25  ;;  %p1194_p0 = scmp.ne.s32.totalorder %s879_s12, %s1193_s0  ;;  %p1199_p2 = scmp.lt.s32.totalorder %s1193_s0, %s1193_s0 }
 0x109   :  { %1132 = vmatpush3.bf16.msra.mxu0 %v1131_v33  ;;  %1164 = vmatpush3.bf16.msra.mxu1 %v1163_v34  ;;  %v1695_v33 = vshrl.u32 %v253_v32, 7  ;;  %p1200_p3 = por %p1199_p2, %p1198_p1 }
 0x10a   :  { %1134 = vmatprep.subr.bf16.mxu0 %v1133_v37  ;;  %1166 = vmatprep.subr.bf16.mxu1 %v1165_v38 }
 0x10b   :  { %v255_v34 = vsub.s32 0, %v1695_v33  ;;  %v263_v35 = vsub.s32 2, %v1695_v33  ;;  %v259_v37 = vsub.s32 1, %v1695_v33  ;;  %v267_v38 = vsub.s32 3, %v1695_v33  ;;  %p1201_p4 = pnand %p1200_p3, %p1194_p0 }
 0x10d   :  { %1136 = vmatpush3.bf16.msra.mxu0 %v1135_v46  ;;  %1168 = vmatpush3.bf16.msra.mxu1 %v1167_v47  ;;  %v256_v39 = vrot.slane %v251_v36, %v255_v34  ;;  %v264_v40 = vrot.slane %v251_v36, %v263_v35  ;;  %v260_v41 = vrot.slane %v251_v36, %v259_v37 }
 0x10e   :  { %1138 = vmatprep.subr.bf16.mxu0 %v1137_v50  ;;  %1170 = vmatprep.subr.bf16.mxu1 %v1169_v51  ;;  %v268_v42 = vrot.slane %v251_v36, %v267_v38  ;;  %v684_v20 = vrot.slane %v671_v18, %v263_v35  ;;  %v680_v21 = vrot.slane %v671_v18, %v259_v37 }
 0x111   :  { %1140 = vmatpush3.bf16.msra.mxu0 %v1139_v58  ;;  %1172 = vmatpush3.bf16.msra.mxu1 %v1171_v59 }
 0x112   :  { %1142 = vmatprep.subr.bf16.mxu0 %v1141_v62  ;;  %1174 = vmatprep.subr.bf16.mxu1 %v1173_v63 }
 0x115   :  { %1144 = vmatpush3.bf16.msra.mxu0 %v1143_v6  ;;  %1176 = vmatpush3.bf16.msra.mxu1 %v1175_v7 }
 0x116   :  { %1146 = vmatprep.subr.bf16.mxu0 %v1145_v8  ;;  %1178 = vmatprep.subr.bf16.mxu1 %v1177_v9 }
 0x119   :  { %1148 = vmatpush3.bf16.msra.mxu0 %v1147_v13  ;;  %1180 = vmatpush3.bf16.msra.mxu1 %v1179_v15 }
 0x11a   :  { %1150 = vmatprep.subr.bf16.mxu0 %v1149_v19  ;;  %1182 = vmatprep.subr.bf16.mxu1 %v1181_v23  ;;  %v676_v19 = vrot.slane %v671_v18, %v255_v34 }
 0x11d   :  { %1152 = vmatpush3.bf16.msra.mxu0 %v1151_v24  ;;  %1184 = vmatpush3.bf16.msra.mxu1 %v1183_v27 }
 0x11e   :  { %897 = vmatprep.subr.msk.mxu0 %vm284_vm0, %v695_v30  ;;  %901 = vmatprep.subr.msk.mxu1 %vm284_vm0, %v696_v31 }
 0x1d2   :  { %v359_v43 = vpop.f32.mrb[4].mxu0  ;;  %v436_v45 = vpop.f32.mrb[4].mxu1 }
 0x1d3   :  { %v360_v46 = vadd.f32 %v359_v43, %v256_v39  ;;  %v437_v47 = vadd.f32 %v436_v45, %v264_v40  ;;  %v361_v48 = vpop.f32.mrb[5].mxu0  ;;  %v438_v49 = vpop.f32.mrb[5].mxu1 }
 0x1d4   :  { %v362_v50 = vadd.f32 %v361_v48, %v260_v41  ;;  %v439_v51 = vadd.f32 %v438_v49, %v268_v42 }
 0x1d5   :  { %v447_v56 = vmax.f32 %v360_v46, 0.0  ;;  %v449_v57 = vmax.f32 %v437_v47, 0.0 }
 0x1d6   :  { %v448_v52 = vmax.f32 %v362_v50, 0.0  ;;  %v450_v53 = vmax.f32 %v439_v51, 0.0  ;;  %v365_v54 = vpop.f32.mrb[6].mxu0  ;;  %v442_v55 = vpop.f32.mrb[6].mxu1 }
 0x1d7   :  { %v366_v58 = vadd.f32 %v365_v54, %v256_v39  ;;  %v443_v59 = vadd.f32 %v442_v55, %v264_v40  ;;  %v367_v60 = vpop.f32.mrb[7].mxu0  ;;  %v444_v61 = vpop.f32.mrb[7].mxu1 }
 0x1d8   :  { %v368_v62 = vadd.f32 %v367_v60, %v260_v41  ;;  %v445_v63 = vadd.f32 %v444_v61, %v268_v42  ;;  %583 = vmatprep.mubr.f32.mxu0 %v448_v52  ;;  %658 = vmatprep.mubr.f32.mxu1 %v450_v53 }
 0x1d9   :  { %584 = vmatmul.mubr.f32.vlgmr.msra.gmra.mrb[8].mxu0 %v447_v56  ;;  %659 = vmatmul.mubr.f32.vlgmr.msra.gmra.mrb[8].mxu1 %v449_v57  ;;  %v451_v2 = vmax.f32 %v366_v58, 0.0  ;;  %v453_v3 = vmax.f32 %v443_v59, 0.0 }
 0x1da   :  { %v452_v0 = vmax.f32 %v368_v62, 0.0  ;;  %v454_v1 = vmax.f32 %v445_v63, 0.0  ;;  %898 = vmatpush1.msk.msra.mxu0 %vm284_vm0, %v669_v28  ;;  %902 = vmatpush1.msk.msra.mxu1 %vm284_vm0, %v670_v29 }
 0x1dc   :  { %588 = vmatprep.mubr.f32.mxu0 %v452_v0  ;;  %663 = vmatprep.mubr.f32.mxu1 %v454_v1 }
 0x1dd   :  { %589 = vmatmul.mubr.f32.gmra.mrb[10].mxu0 %v451_v2  ;;  %664 = vmatmul.mubr.f32.gmra.mrb[10].mxu1 %v453_v3 }
 0x1de   :  { %775 = vmatprep.mubr.f32.mxu0 %v1217_v44  ;;  %852 = vmatprep.mubr.f32.mxu1 %v1217_v44 }
 0x2ac   :  { %v1013_v4 = vpop.f32.mrb[8].mxu0  ;;  %v1051_v5 = vpop.f32.mrb[8].mxu1 }
 0x2ad   :  { %v1014_v6 = vpop.f32.mrb[9].mxu0  ;;  %v1052_v7 = vpop.f32.mrb[9].mxu1 }
 0x2ae   :  { %v1015_v8 = vadd.f32 %v1014_v6, %v1013_v4  ;;  %v1053_v9 = vadd.f32 %v1052_v7, %v1051_v5 }
 0x2b0   :  { %v661_v10 = vadd.f32 %v1053_v9, %v1015_v8  ;;  %v1016_v11 = vpop.f32.mrb[10].mxu0  ;;  %v1054_v12 = vpop.f32.mrb[10].mxu1 }
 0x2b1   :  { %v1017_v13 = vpop.f32.mrb[11].mxu0  ;;  %v1055_v14 = vpop.f32.mrb[11].mxu1 }
 0x2b2   :  { %v1018_v15 = vadd.f32 %v1017_v13, %v1016_v11  ;;  %v1056_v16 = vadd.f32 %v1055_v14, %v1054_v12  ;;  %899 = vmatmul.mubr.msk.f32.vlgmr.msra.gmra.mrb[12].mxu0 %vm277_vm1, %v661_v10  ;;  %903 = vmatmul.mubr.msk.f32.vlgmr.msra.gmra.mrb[12].mxu1 %vm277_vm1, %v661_v10 }
 0x2b3   :  { %781 = vmatprep.mubr.f32.mxu0 %v1217_v44  ;;  %858 = vmatprep.mubr.f32.mxu1 %v1217_v44  ;;  %v688_v44 = vrot.slane %v671_v18, %v267_v38 }
 0x2b4   :  { %v666_v17 = vadd.f32 %v1056_v16, %v1018_v15 }
 0x2b6   :  { %900 = vmatmul.mubr.msk.f32.gmra.mrb[14].mxu0 %vm277_vm1, %v666_v17  ;;  %904 = vmatmul.mubr.msk.f32.gmra.mrb[14].mxu1 %vm277_vm1, %v666_v17 }
 0x385   :  { %v777_v22 = vpop.f32.mrb[12].mxu0  ;;  %v854_v23 = vpop.f32.mrb[12].mxu1 }
 0x386   :  { %v778_v24 = vadd.f32 %v777_v22, %v676_v19  ;;  %v855_v25 = vadd.f32 %v854_v23, %v684_v20  ;;  %v779_v26 = vpop.f32.mrb[13].mxu0  ;;  %v856_v27 = vpop.f32.mrb[13].mxu1 }
 0x387   :  { %v780_v28 = vadd.f32 %v779_v26, %v680_v21  ;;  %v857_v29 = vadd.f32 %v856_v27, %v688_v44 }
 0x388   :  { %865 = vst [vmem:[#allocation2] sm:$0xff] %v778_v24  ;;  %867 = vst [vmem:[#allocation2 + $0x10] sm:$0xff] %v855_v25 }
 0x389   :  { %866 = vst [vmem:[#allocation2 + $0x8] sm:$0xff] %v780_v28  ;;  %868 = vst [vmem:[#allocation2 + $0x18] sm:$0xff] %v857_v29  ;;  %v783_v30 = vpop.f32.mrb[14].mxu0  ;;  %v860_v31 = vpop.f32.mrb[14].mxu1 }
 0x38a   :  { %v784_v32 = vadd.f32 %v783_v30, %v676_v19  ;;  %v861_v34 = vadd.f32 %v860_v31, %v684_v20  ;;  %v785_v33 = vpop.f32.mrb[15].mxu0  ;;  %v862_v35 = vpop.f32.mrb[15].mxu1 }
 0x38b   :  { %v786_v36 = vadd.f32 %v785_v33, %v680_v21  ;;  %v863_v37 = vadd.f32 %v862_v35, %v688_v44 }
 0x38c   :  { %869 = vst [vmem:[#allocation2 + $0x20] sm:$0xff] %v784_v32  ;;  %871 = vst [vmem:[#allocation2 + $0x30] sm:$0xff] %v861_v34 }
 0x38d   :  { %870 = vst [vmem:[#allocation2 + $0x28] sm:$0xff] %v786_v36  ;;  %872 = vst [vmem:[#allocation2 + $0x38] sm:$0xff] %v863_v37 }
 0x38e   :  { %1204 = shalt.err (!%p1201_p4)
}
 0x38f   :  { %s1205_s15 = scalar_lea.hbm %s1752_s7, 1024 }
 0x390   :  { %p1206_p5 = scmp.ne.s32.totalorder %s1752_s7, %s1205_s15  ;;  %p1209_p6 = scmp.lt.u32.totalorder %s1205_s15, %s1752_s7 }
 0x392   :  { %p1211_p7 = pnand %p1209_p6, %p1206_p5 }
 0x394   :  { %1214 = shalt.err (!%p1211_p7)
}
 0x395   :  { %s1219_s20 = smov 512   ;;  %s1220_s21 = smov 32  }
 0x396   :  { %884 = dma.vmem_to_hbm [thread:$0]  %s879_s12, 1024, %s1752_s7, [#allocation3], %s1219_s20, %s1219_s20, %s1220_s21  }
 0x397   :  { %1215 = dma.done.wait [#allocation3], 1024  }
 0x398   :  { %1216 = vsyncadd [#allocation3], 4294966272 }
 0x399   :  { %888 = vsyncpa [#allocation3], 1 }

</bundles_post_ra>
